<compile_context>
chip_gen: v6e
topology: v6e:2x2x1
jax: 0.10.0
libtpu: 0.0.40
codegen_flags: <defaults>
</compile_context>

<pallas_src>
import jax
import jax.numpy as jnp
from jax.experimental import pallas as pl
from jax.experimental.pallas import tpu as pltpu


def _round_up(v: int, m: int) -> int:
    return ((v + m - 1) // m) * m


def _exu_kernel_acc(x_ref, w_ref, b_ref, o_ref, acc_ref):
    # Grid = (batch tiles, out-feature tiles, K tiles); K innermost.
    k = pl.program_id(2)

    @pl.when(k == 0)
    def _():
        acc_ref[...] = jnp.zeros_like(acc_ref)

    # Bias subtract in f32 (cheap VPU work hidden under the MXU), then cast to
    # the MXU compute dtype. exp(weight) was precomputed in the wrapper.
    shifted = (x_ref[...] - b_ref[...]).astype(w_ref.dtype)
    acc_ref[...] += jnp.dot(shifted, w_ref[...],
                            preferred_element_type=jnp.float32)

    @pl.when(k == pl.num_programs(2) - 1)
    def _():
        o_ref[...] = jnp.clip(acc_ref[...], 0.0, 1.0).astype(o_ref.dtype)


def _exu_kernel_single_k(x_ref, w_ref, b_ref, o_ref):
    # Fast path when the whole reduction fits in one K tile: skip the f32
    # accumulator scratch and its zero/accumulate/read-back VMEM passes.
    shifted = (x_ref[...] - b_ref[...]).astype(w_ref.dtype)
    acc = jnp.dot(shifted, w_ref[...], preferred_element_type=jnp.float32)
    o_ref[...] = jnp.clip(acc, 0.0, 1.0).astype(o_ref.dtype)


def exu_layer(x, weight, bias, *, compute_dtype=jnp.bfloat16,
              tm=512, tn=512, tk=512):
    """ExU forward: clip((x - bias) @ exp(weight), 0, 1), tiled on TPU."""
    B, Fin = x.shape
    Fin_w, Fout = weight.shape
    assert Fin == Fin_w and bias.shape == (Fin,)
    out_dtype = x.dtype

    # Hoist exp(weight) out of the kernel hot path (single XLA pass); bf16
    # halves HBM bytes for the weights and runs the MXU at bf16 rate.
    exp_w = jnp.exp(weight.astype(jnp.float32)).astype(compute_dtype)

    # Tile sizes: respect (8, 128) layout minimums and shrink to the padded
    # problem when it is smaller than the default tile.
    tm = min(tm, _round_up(B, 8))
    tk = min(tk, _round_up(Fin, 128))
    tn = min(tn, _round_up(Fout, 128))

    # Pad every dim to a multiple of its tile. Zero padding is exact: padded
    # exp(W) rows/cols are 0 (padded AFTER exp), so padded K columns and Fout
    # columns contribute nothing; padded batch rows are sliced off below.
    B_p, Fin_p, Fout_p = _round_up(B, tm), _round_up(Fin, tk), _round_up(Fout, tn)
    x_p = jnp.pad(x, ((0, B_p - B), (0, Fin_p - Fin)))
    w_p = jnp.pad(exp_w, ((0, Fin_p - Fin), (0, Fout_p - Fout)))
    b_p = jnp.pad(bias, (0, Fin_p - Fin)).reshape(1, Fin_p).astype(x.dtype)

    gi, gj, gk = B_p // tm, Fout_p // tn, Fin_p // tk
    grid = (gi, gj, gk)
    single_k = (gk == 1)

    kernel = _exu_kernel_single_k if single_k else _exu_kernel_acc
    scratch = [] if single_k else [pltpu.VMEM((tm, tn), jnp.float32)]

    itemsize = jnp.dtype(x.dtype).itemsize
    cost = pl.CostEstimate(
        flops=2 * B_p * Fin_p * Fout_p + B_p * Fin_p * gj,
        transcendentals=0,
        bytes_accessed=(B_p * Fin_p * itemsize * gj            # x tiles (per j)
                        + Fin_p * Fout_p * exp_w.dtype.itemsize
                        + Fin_p * itemsize
                        + B_p * Fout_p * itemsize),
    )

    out = pl.pallas_call(
        kernel,
        out_shape=jax.ShapeDtypeStruct((B_p, Fout_p), out_dtype),
        grid_spec=pltpu.PrefetchScalarGridSpec(
            num_scalar_prefetch=0,
            grid=grid,
            in_specs=[
                pl.BlockSpec((tm, tk), lambda i, j, k: (i, k)),   # x tile
                pl.BlockSpec((tk, tn), lambda i, j, k: (k, j)),   # exp(W) tile
                pl.BlockSpec((1, tk), lambda i, j, k: (0, k)),    # bias tile
            ],
            out_specs=pl.BlockSpec((tm, tn), lambda i, j, k: (i, j)),
            scratch_shapes=scratch,
        ),
        compiler_params=pltpu.CompilerParams(
            dimension_semantics=("parallel", "parallel", "arbitrary"),
            vmem_limit_bytes=32 * 1024 * 1024,  # ~6 MiB used; headroom on v5e/v6e/v7x
        ),
        cost_estimate=cost,
    )(x_p, w_p, b_p)

    return out[:B, :Fout]


def truncated_normal(key, shape, mean=0.0, std=1.0, dtype=jnp.float32):
    # Deterministic stand-in for torch truncated_normal_ init (truncate at +/-2 sigma).
    t = jax.random.truncated_normal(key, -2.0, 2.0, shape, dtype)
    return t * std + mean


if __name__ == "__main__":
    key = jax.random.PRNGKey(0)
    k_x, k_w, k_b, k_x2, k_w2, k_b2 = jax.random.split(key, 6)

    # --- Test 1: tiny NAM-style shape, f32 compute, single-K fast path ------
    batch, fin, fout = 8, 32, 16
    x = jax.random.normal(k_x, (batch, fin), dtype=jnp.float32)
    w = truncated_normal(k_w, (fin, fout), mean=4.0, std=0.5)
    b = truncated_normal(k_b, (fin,), mean=0.0, std=0.5)

    out = exu_layer(x, w, b, compute_dtype=jnp.float32)
    jax.block_until_ready(out)
    ref = jnp.clip((x - b[None, :]) @ jnp.exp(w), 0.0, 1.0)
    assert out.shape == (batch, fout)
    assert jnp.allclose(out, ref, atol=1e-5, rtol=1e-5)

    # --- Test 2: larger shape exercising the (i, j, k) grid + accumulator ---
    batch2, fin2, fout2 = 640, 768, 384
    x2 = jax.random.normal(k_x2, (batch2, fin2), dtype=jnp.float32)
    w2 = truncated_normal(k_w2, (fin2, fout2), mean=0.0, std=0.5)
    b2 = truncated_normal(k_b2, (fin2,), mean=0.0, std=0.5)

    out2 = exu_layer(x2, w2, b2, compute_dtype=jnp.bfloat16)
    jax.block_until_ready(out2)
    # Reference with matching bf16 operand rounding (f32 accumulation).
    sh = (x2 - b2[None, :]).astype(jnp.bfloat16)
    ew = jnp.exp(w2).astype(jnp.bfloat16)
    ref2 = jnp.clip(jnp.dot(sh, ew, preferred_element_type=jnp.float32), 0.0, 1.0)
    assert out2.shape == (batch2, fout2)
    assert jnp.allclose(out2, ref2, atol=1e-3, rtol=1e-3)

    # TODO(synk): ActivationLayer.forward is abstract in the reference module;
    # this kernel implements the concrete ExU subclass semantics.
    print("KERNEL_OK")
</pallas_src>

<mosaic_0001>
module attributes {stable_mosaic.version = 11 : i64} {
  func.func @_exu_kernel_single_k(%arg0: i32, %arg1: i32, %arg2: i32, %arg3: memref<8x128xf32, #tpu.memory_space<vmem>>, %arg4: memref<128x128xf32, #tpu.memory_space<vmem>>, %arg5: memref<1x128xf32, #tpu.memory_space<vmem>>, %arg6: memref<8x128xf32, #tpu.memory_space<vmem>>) attributes {dimension_semantics = [#tpu.dimension_semantics<parallel>, #tpu.dimension_semantics<parallel>, #tpu.dimension_semantics<arbitrary>], iteration_bounds = array<i64: 1, 1, 1>, scalar_prefetch = 0 : i64, scratch_operands = 0 : i64, tpu.core_type = #tpu.core_type<tc>, window_params = [{transform_indices = @transform_0, window_bounds = array<i64: 8, 128>}, {transform_indices = @transform_1, window_bounds = array<i64: 128, 128>}, {transform_indices = @transform_2, window_bounds = array<i64: 1, 128>}, {transform_indices = @transform_3, window_bounds = array<i64: 8, 128>}]} {
    %c0 = arith.constant 0 : index
    %c0_0 = arith.constant 0 : index
    %0 = vector.load %arg3[%c0, %c0_0] : memref<8x128xf32, #tpu.memory_space<vmem>>, vector<8x128xf32>
    %c0_1 = arith.constant 0 : index
    %c0_2 = arith.constant 0 : index
    %1 = vector.load %arg5[%c0_1, %c0_2] : memref<1x128xf32, #tpu.memory_space<vmem>>, vector<1x128xf32>
    %2 = vector.broadcast %1 : vector<1x128xf32> to vector<8x128xf32>
    %3 = arith.subf %0, %2 : vector<8x128xf32>
    %c0_3 = arith.constant 0 : index
    %c0_4 = arith.constant 0 : index
    %4 = vector.load %arg4[%c0_3, %c0_4] : memref<128x128xf32, #tpu.memory_space<vmem>>, vector<128x128xf32>
    %cst = arith.constant dense<0.000000e+00> : vector<8x128xf32>
    %5 = tpu.matmul %3, %4, %cst {dimension_numbers = #tpu.dot_dimension_numbers<[1], [0], [0], [1], [0, 0, 1, 1], [], []>} : vector<8x128xf32>, vector<128x128xf32>, vector<8x128xf32> -> vector<8x128xf32>
    %cst_5 = arith.constant 0.000000e+00 : f32
    %cst_6 = arith.constant 1.000000e+00 : f32
    %6 = vector.broadcast %cst_5 : f32 to vector<8x128xf32>
    %7 = arith.maximumf %6, %5 : vector<8x128xf32>
    %8 = vector.broadcast %cst_6 : f32 to vector<8x128xf32>
    %9 = arith.minimumf %8, %7 : vector<8x128xf32>
    %c0_7 = arith.constant 0 : index
    %c0_8 = arith.constant 0 : index
    %10 = vector.load %arg6[%c0_7, %c0_8] : memref<8x128xf32, #tpu.memory_space<vmem>>, vector<8x128xf32>
    tpu.vector_store %arg6[%c0_7, %c0_8], %9 {strides = array<i32>} : memref<8x128xf32, #tpu.memory_space<vmem>>, vector<8x128xf32>,
    return
  }
  func.func @transform_0(%arg0: i32, %arg1: i32, %arg2: i32) -> (i32, i32) {
    %c0_i32 = arith.constant 0 : i32
    return %arg0, %arg2 : i32, i32
  }
  func.func @transform_1(%arg0: i32, %arg1: i32, %arg2: i32) -> (i32, i32) {
    %c0_i32 = arith.constant 0 : i32
    return %arg2, %arg1 : i32, i32
  }
  func.func @transform_2(%arg0: i32, %arg1: i32, %arg2: i32) -> (i32, i32) {
    %c0_i32 = arith.constant 0 : i32
    %c0_i32_0 = arith.constant 0 : i32
    return %c0_i32, %arg2 : i32, i32
  }
  func.func @transform_3(%arg0: i32, %arg1: i32, %arg2: i32) -> (i32, i32) {
    %c0_i32 = arith.constant 0 : i32
    return %arg0, %arg1 : i32, i32
  }
}

</mosaic_0001>

<bundles_post_ra>
// kernel: tpu_custom_call.1
= control target key start
LH: loop header
LB: loop body
LE: loop exit
PB: predicated region body
PF: predicated region fallthrough
CT: control target
= control target key end

     0   :  { %8 = vsyncpa [#allocation3], 0  ;;  %s320_s0 = inlined_call_operand.hbm [shape: f32[8,128], index: 0, kind: input, shape index: {}]   ;;  %s321_s1 = inlined_call_operand.hbm [shape: f32[128,128], index: 1, kind: input, shape index: {}]   ;;  %s322_s2 = inlined_call_operand.vmem [shape: f32[1,128], index: 2, kind: input, shape index: {}]   ;;  %s323_s3 = inlined_call_operand.hbm [shape: f32[8,128], index: 3, kind: output, shape index: {}]  }
   0x1   :  { %9 = vsyncpa [#allocation6], 0 }
   0x2   :  { %10 = vsyncpa [#allocation4], 0  ;;  %s281_s12 = smov [#allocation2]   ;;  %s282_s14 = smov [#allocation5]  }
   0x3   :  { %s17_s13 = sshll.u32 %s281_s12, 4  ;;  %s26_s15 = sshll.u32 %s282_s14, 4  ;;  %s18_s13 = int_to_ptr.vmem [resolvable:$true] %s17_s13  ;;  %s27_s15 = int_to_ptr.vmem [resolvable:$true] %s26_s15 }
   0x4   :  { %s223_s16 = scalar_lea.vmem %s18_s13, 128  ;;  %p228_p1 = scmp.lt.s32.totalorder %s18_s13, %s18_s13 }
   0x5   :  { %p224_p0 = scmp.ne.s32.totalorder %s18_s13, %s223_s16  ;;  %p229_p2 = scmp.lt.s32.totalorder %s223_s16, %s223_s16 }
   0x7   :  { %p230_p3 = por %p229_p2, %p228_p1 }
   0x9   :  { %p231_p4 = pnand %p230_p3, %p224_p0 }
   0xb   :  { %234 = shalt.err (!%p231_p4)
}
   0xc   :  { %20 = dma.hbm_to_vmem [thread:$0]  %s320_s0, 128, %s18_s13, [#allocation3]  }
   0xd   :  { %s243_s19 = scalar_lea.vmem %s27_s15, 2048  ;;  %p248_p6 = scmp.lt.s32.totalorder %s27_s15, %s27_s15 }
   0xe   :  { %p244_p5 = scmp.ne.s32.totalorder %s27_s15, %s243_s19  ;;  %p249_p7 = scmp.lt.s32.totalorder %s243_s19, %s243_s19 }
  0x10   :  { %p250_p8 = por %p249_p7, %p248_p6 }
  0x12   :  { %p251_p9 = pnand %p250_p8, %p244_p5 }
  0x14   :  { %254 = shalt.err (!%p251_p9)
}
  0x15   :  { %s283_s20 = smov 128   ;;  %s284_s21 = smov 8  }
  0x16   :  { %32 = dma.hbm_to_vmem [thread:$0]  %s321_s1, 2048, %s27_s15, [#allocation6], %s283_s20, %s283_s20, %s284_s21  }
  0x17   :  { %275 = dma.done.wait [#allocation3], 128  }
  0x18   :  { %276 = vsyncadd [#allocation3], 4294967168 }
  0x19   :  { %277 = dma.done.wait [#allocation6], 2048  }
  0x1a   :  { %278 = vsyncadd [#allocation6], 4294965248  ;;  %v285_v0 = vmov 0.0   ;;  %vm286_vm0 = vmmov 0   ;;  %v65_v1 = vld [vmem:[#allocation5 + $0x78] sm:$0xff]  ;;  %v64_v2 = vld [vmem:[#allocation5 + $0x70] sm:$0xff] }
  0x1b   :  { %173 = vmatprep.subr.mxu0 %v285_v0  ;;  %205 = vmatprep.mubr.msk.f32.mxu0 %vm286_vm0, %v285_v0  ;;  %v63_v3 = vld [vmem:[#allocation5 + $0x68] sm:$0xff]  ;;  %v62_v4 = vld [vmem:[#allocation5 + $0x60] sm:$0xff]  ;;  %v61_v5 = vld [vmem:[#allocation5 + $0x58] sm:$0xff]  ;;  %s287_s24 = smov [#allocation7]  }
  0x1c   :  { %174 = vmatpush3.msra.mxu0 %v65_v1  ;;  %v60_v6 = vld [vmem:[#allocation5 + $0x50] sm:$0xff]  ;;  %v59_v7 = vld [vmem:[#allocation5 + $0x48] sm:$0xff]  ;;  %v58_v8 = vld [vmem:[#allocation5 + $0x40] sm:$0xff]  ;;  %s145_s25 = sshll.u32 %s287_s24, 4  ;;  %s146_s25 = int_to_ptr.vmem [resolvable:$true] %s145_s25 }
  0x1d   :  { %175 = vmatprep.subr.mxu0 %v285_v0  ;;  %v57_v9 = vld [vmem:[#allocation5 + $0x38] sm:$0xff]  ;;  %v56_v10 = vld [vmem:[#allocation5 + $0x30] sm:$0xff]  ;;  %v55_v11 = vld [vmem:[#allocation5 + $0x28] sm:$0xff]  ;;  %s255_s26 = scalar_lea.vmem %s146_s25, 128  ;;  %p260_p11 = scmp.lt.s32.totalorder %s146_s25, %s146_s25 }
  0x1e   :  { %176 = vmatpush3.msra.mxu0 %v64_v2  ;;  %v54_v12 = vld [vmem:[#allocation5 + $0x20] sm:$0xff]  ;;  %v53_v13 = vld [vmem:[#allocation5 + $0x18] sm:$0xff]  ;;  %v52_v14 = vld [vmem:[#allocation5 + $0x10] sm:$0xff]  ;;  %p256_p10 = scmp.ne.s32.totalorder %s146_s25, %s255_s26  ;;  %p261_p12 = scmp.lt.s32.totalorder %s255_s26, %s255_s26 }
  0x1f   :  { %177 = vmatprep.subr.mxu0 %v285_v0  ;;  %v41_v15 = vld [vmem:[#allocation2] sm:$0xff]  ;;  %v51_v17 = vld [vmem:[#allocation5 + $0x8] sm:$0xff]  ;;  %v50_v18 = vld [vmem:[#allocation5] sm:$0xff] }
  0x20   :  { %178 = vmatpush3.msra.mxu0 %v63_v3  ;;  %v155_v16 = vld [vmem:[%s322_s2] ss:$0 sm:$0xff]  ;;  %p262_p13 = por %p261_p12, %p260_p11 }
  0x21   :  { %179 = vmatprep.subr.mxu0 %v285_v0  ;;  %v49_v19 = vsub.f32 %v41_v15, %v155_v16 }
  0x22   :  { %180 = vmatpush3.msra.mxu0 %v62_v4  ;;  %p263_p0 = pnand %p262_p13, %p256_p10 }
  0x23   :  { %181 = vmatprep.subr.mxu0 %v285_v0 }
  0x24   :  { %182 = vmatpush3.msra.mxu0 %v61_v5 }
  0x25   :  { %183 = vmatprep.subr.mxu0 %v285_v0 }
  0x26   :  { %184 = vmatpush3.msra.mxu0 %v60_v6 }
  0x27   :  { %185 = vmatprep.subr.mxu0 %v285_v0 }
  0x28   :  { %186 = vmatpush3.msra.mxu0 %v59_v7 }
  0x29   :  { %187 = vmatprep.subr.mxu0 %v285_v0 }
  0x2a   :  { %188 = vmatpush3.msra.mxu0 %v58_v8 }
  0x2b   :  { %189 = vmatprep.subr.mxu0 %v285_v0 }
  0x2c   :  { %190 = vmatpush3.msra.mxu0 %v57_v9 }
  0x2d   :  { %191 = vmatprep.subr.mxu0 %v285_v0 }
  0x2e   :  { %192 = vmatpush3.msra.mxu0 %v56_v10 }
  0x2f   :  { %193 = vmatprep.subr.mxu0 %v285_v0 }
  0x30   :  { %194 = vmatpush3.msra.mxu0 %v55_v11 }
  0x31   :  { %195 = vmatprep.subr.mxu0 %v285_v0 }
  0x32   :  { %196 = vmatpush3.msra.mxu0 %v54_v12 }
  0x33   :  { %197 = vmatprep.subr.mxu0 %v285_v0 }
  0x34   :  { %198 = vmatpush3.msra.mxu0 %v53_v13 }
  0x35   :  { %199 = vmatprep.subr.mxu0 %v285_v0 }
  0x36   :  { %200 = vmatpush3.msra.mxu0 %v52_v14 }
  0x37   :  { %201 = vmatprep.subr.mxu0 %v285_v0 }
  0x38   :  { %202 = vmatpush3.msra.mxu0 %v51_v17 }
  0x39   :  { %203 = vmatprep.subr.mxu0 %v285_v0 }
  0x3a   :  { %204 = vmatpush3.msra.mxu0 %v50_v18 }
  0x3b   :  { %206 = vmatmul.mubr.f32.vlgmr.msra.gmra.mxu0 %v49_v19 }
  0xfb   :  { %v132_v20 = vpop.f32.mrf.mxu0 }
  0xfc   :  { %v136_v21 = vmax.f32 %v132_v20, 0.0 }
  0xfd   :  { %v207_v22 = vpop.f32.mrf.mxu0 }
  0xfe   :  { %v137_v23 = vmin.f32 %v136_v21, 1.0 }
 0x100   :  { %138 = vst [vmem:[#allocation7] sm:$0xff] %v137_v23 }
 0x101   :  { %266 = shalt.err (!%p263_p0)
}
 0x102   :  { %148 = dma.vmem_to_hbm [thread:$0]  %s146_s25, 128, %s323_s3, [#allocation4]  }
 0x103   :  { %279 = dma.done.wait [#allocation4], 128  }
 0x104   :  { %280 = vsyncadd [#allocation4], 4294967168 }
 0x105   :  { %152 = vsyncpa [#allocation3], 1 }
 0x106   :  { %153 = vsyncpa [#allocation6], 1 }
 0x107   :  { %154 = vsyncpa [#allocation4], 1 }

</bundles_post_ra>
